<compile_context>
chip_gen: v7x
topology: tpu7x:2x2x1
jax: 0.10.0
libtpu: 0.0.40
codegen_flags: <defaults>
</compile_context>

<pallas_src>
import math
import functools

import jax
import jax.numpy as jnp
from jax import lax
from jax.experimental import pallas as pl
from jax.experimental.pallas import tpu as pltpu


def mha_kernel(x_ref, wq_ref, bq_ref, wk_ref, bk_ref, wv_ref, bv_ref,
               wfc_ref, bfc_ref, o_ref, *, num_heads: int, head_dim: int):
    """One grid step = one batch element.

    x_ref   : [1, S, E]   input hidden states
    wq/wk/wv_ref : [E, E] packed projection weights (x @ W form; head h owns
                          columns [h*d:(h+1)*d])
    bq/bk/bv_ref : [1, E] packed projection biases
    wfc_ref : [E, E]      output projection weight (x @ W form)
    bfc_ref : [1, E]      output projection bias
    o_ref   : [1, S, E]   output block
    """
    inv_scale = 1.0 / math.sqrt(head_dim)

    # bf16 operands for the MXU, f32 accumulation.
    x = x_ref[0].astype(jnp.bfloat16)                                  # [S, E]

    # Packed projections for ALL heads: one K=E matmul each (MXU-efficient).
    q = (jnp.dot(x, wq_ref[...].astype(jnp.bfloat16),
                 preferred_element_type=jnp.float32)
         + bq_ref[...]) * inv_scale                                    # [S, E]
    k = (jnp.dot(x, wk_ref[...].astype(jnp.bfloat16),
                 preferred_element_type=jnp.float32) + bk_ref[...])    # [S, E]
    v = (jnp.dot(x, wv_ref[...].astype(jnp.bfloat16),
                 preferred_element_type=jnp.float32) + bv_ref[...])    # [S, E]

    # Per-head attention, in-register static loop (no head grid axis).
    head_outs = []
    for h in range(num_heads):
        sl = slice(h * head_dim, (h + 1) * head_dim)
        qh = q[:, sl].astype(jnp.bfloat16)                             # [S, d]
        kh = k[:, sl].astype(jnp.bfloat16)                             # [S, d]
        vh = v[:, sl].astype(jnp.bfloat16)                             # [S, d]

        # Scores without an explicit transpose: contract last dims.
        s = lax.dot_general(qh, kh, (((1,), (1,)), ((), ())),
                            preferred_element_type=jnp.float32)        # [S, S]

        # Softmax numerator in f32 (portable to v5e: no bf16 EUP/VALU there).
        s_max = jnp.max(s, axis=-1, keepdims=True)
        p = jnp.exp(s - s_max)                                         # [S, S]
        denom = jnp.sum(p, axis=-1, keepdims=True)                     # [S, 1]

        # Un-normalized P@V on the MXU, then rescale the small [S, d] result
        # (S*d VALU mults instead of S*S); reciprocal goes to the EUP slot.
        head_out = jnp.dot(p.astype(jnp.bfloat16), vh,
                           preferred_element_type=jnp.float32)         # [S, d]
        head_out = head_out * pl.reciprocal(denom, approx=True)
        head_outs.append(head_out)

    att = jnp.concatenate(head_outs, axis=-1)                          # [S, E]

    # Single packed output projection (K = E) + bias, added once.
    out = jnp.dot(att.astype(jnp.bfloat16),
                  wfc_ref[...].astype(jnp.bfloat16),
                  preferred_element_type=jnp.float32) + bfc_ref[...]   # [S, E]
    o_ref[0] = out.astype(o_ref.dtype)


def multi_head_attention(x, params, *, num_heads: int):
    """x: [B, S, E] float32. params: dict of packed weights (see init_params)."""
    B, S, E = x.shape
    head_dim = E // num_heads

    kernel = functools.partial(mha_kernel, num_heads=num_heads,
                               head_dim=head_dim)

    # Weights/biases: constant block index across the batch grid axis, so they
    # are DMA'd into VMEM once and stay resident for all batch elements.
    w_spec = pl.BlockSpec((E, E), lambda b: (0, 0))
    b_spec = pl.BlockSpec((1, E), lambda b: (0, 0))

    # Explicit scoped-VMEM budget derived from the tile sizes (with headroom
    # for q/k/v/att/score intermediates), clamped to a per-generation-safe
    # range (>= v5e default 16 MiB, <= v7x physical 64 MiB).
    io_bytes = 2 * 2 * S * E * 4                       # x + out, double-buffered
    w_bytes = 4 * E * E * 4 + 4 * E * 4                # resident weights + biases
    inter_bytes = 12 * S * E * 4 + 2 * S * S * 4       # q/k/v/att/scores etc.
    vmem_limit = int(4 * (io_bytes + w_bytes + inter_bytes))
    vmem_limit = min(max(vmem_limit, 16 * 1024 * 1024), 64 * 1024 * 1024)

    return pl.pallas_call(
        kernel,
        out_shape=jax.ShapeDtypeStruct((B, S, E), x.dtype),
        grid_spec=pltpu.PrefetchScalarGridSpec(
            num_scalar_prefetch=0,
            grid=(B,),
            in_specs=[
                pl.BlockSpec((1, S, E), lambda b: (b, 0, 0)),   # x
                w_spec, b_spec,                                 # wq, bq
                w_spec, b_spec,                                 # wk, bk
                w_spec, b_spec,                                 # wv, bv
                w_spec, b_spec,                                 # wfc, bfc
            ],
            out_specs=pl.BlockSpec((1, S, E), lambda b: (b, 0, 0)),
        ),
        compiler_params=pltpu.CompilerParams(
            dimension_semantics=("parallel",),
            vmem_limit_bytes=vmem_limit),
    )(x, params["wq"], params["bq"], params["wk"], params["bk"],
      params["wv"], params["bv"], params["wfc"], params["bfc"])


def init_params(key, embed_dim, num_heads):
    """Deterministic synthetic parameters.

    PyTorch nn.Linear(in, out) stores weight [out, in] and computes x @ W.T + b.
    We generate weights in [out, in] form per head, then transpose+pack so
    x @ W_packed works with W_packed [E, E]; head h owns columns [h*d:(h+1)*d].
    """
    head_dim = embed_dim // num_heads
    keys = jax.random.split(key, 3 * num_heads * 2 + 2)
    ki = iter(range(len(keys)))

    def lin(kw, kb, out_dim, in_dim):
        w = jax.random.normal(kw, (out_dim, in_dim), jnp.float32) * 0.05
        b = jax.random.normal(kb, (out_dim,), jnp.float32) * 0.05
        return w, b

    def pack(per_head):   # list of ([d, E] weight, [d] bias) -> ([E, E], [1, E])
        w = jnp.concatenate([w_h.T for w_h, _ in per_head], axis=1)
        b = jnp.concatenate([b_h for _, b_h in per_head], axis=0)[None, :]
        return w, b

    q_list, k_list, v_list = [], [], []
    for _ in range(num_heads):
        q_list.append(lin(keys[next(ki)], keys[next(ki)], head_dim, embed_dim))
        k_list.append(lin(keys[next(ki)], keys[next(ki)], head_dim, embed_dim))
        v_list.append(lin(keys[next(ki)], keys[next(ki)], head_dim, embed_dim))

    wq, bq = pack(q_list)
    wk, bk = pack(k_list)
    wv, bv = pack(v_list)

    wfc_t, bfc = lin(keys[next(ki)], keys[next(ki)], embed_dim, embed_dim)
    wfc = wfc_t.T                      # x @ W form
    bfc = bfc[None, :]

    return {"wq": wq, "bq": bq, "wk": wk, "bk": bk,
            "wv": wv, "bv": bv, "wfc": wfc, "bfc": bfc}


def mha_reference(x, params, *, num_heads):
    """Pure-JAX f32 reference matching the PyTorch forward semantics."""
    B, S, E = x.shape
    d = E // num_heads
    q = x @ params["wq"] + params["bq"]
    k = x @ params["wk"] + params["bk"]
    v = x @ params["wv"] + params["bv"]
    outs = []
    for h in range(num_heads):
        qh, kh, vh = (t[..., h * d:(h + 1) * d] for t in (q, k, v))
        s = jnp.einsum("bsd,btd->bst", qh, kh) / math.sqrt(d)
        w = jax.nn.softmax(s, axis=-1)
        outs.append(jnp.einsum("bst,btd->bsd", w, vh))
    cat = jnp.concatenate(outs, axis=-1)
    return cat @ params["wfc"] + params["bfc"]


if __name__ == "__main__":
    B, S, E, H = 2, 8, 32, 4          # batch, seq, embed_dim, num_heads

    key = jax.random.PRNGKey(0)
    kx, kp = jax.random.split(key)
    x = jax.random.normal(kx, (B, S, E), jnp.float32)
    params = init_params(kp, E, H)

    out = multi_head_attention(x, params, num_heads=H)
    out = jax.block_until_ready(out)

    ref = mha_reference(x, params, num_heads=H)
    assert out.shape == (B, S, E)
    # bf16 MXU operands + approx reciprocal vs an f32 reference -> looser tol.
    assert jnp.allclose(out, ref, atol=2e-2, rtol=2e-2), "mismatch vs reference"

    print("KERNEL_OK")
</pallas_src>

<mosaic_0001>
module attributes {stable_mosaic.version = 11 : i64} {
  func.func @mha_kernel(%arg0: i32, %arg1: memref<1x8x32xf32, #tpu.memory_space<vmem>>, %arg2: memref<32x32xf32, #tpu.memory_space<vmem>>, %arg3: memref<1x32xf32, #tpu.memory_space<vmem>>, %arg4: memref<32x32xf32, #tpu.memory_space<vmem>>, %arg5: memref<1x32xf32, #tpu.memory_space<vmem>>, %arg6: memref<32x32xf32, #tpu.memory_space<vmem>>, %arg7: memref<1x32xf32, #tpu.memory_space<vmem>>, %arg8: memref<32x32xf32, #tpu.memory_space<vmem>>, %arg9: memref<1x32xf32, #tpu.memory_space<vmem>>, %arg10: memref<1x8x32xf32, #tpu.memory_space<vmem>>) attributes {dimension_semantics = [#tpu.dimension_semantics<parallel>], iteration_bounds = array<i64: 2>, scalar_prefetch = 0 : i64, scratch_operands = 0 : i64, tpu.core_type = #tpu.core_type<tc>, window_params = [{transform_indices = @transform_0, window_bounds = array<i64: 1, 8, 32>}, {pipeline_mode = #tpu.pipeline_mode<synchronous>, transform_indices = @transform_1, window_bounds = array<i64: 32, 32>}, {pipeline_mode = #tpu.pipeline_mode<synchronous>, transform_indices = @transform_2, window_bounds = array<i64: 1, 32>}, {pipeline_mode = #tpu.pipeline_mode<synchronous>, transform_indices = @transform_3, window_bounds = array<i64: 32, 32>}, {pipeline_mode = #tpu.pipeline_mode<synchronous>, transform_indices = @transform_4, window_bounds = array<i64: 1, 32>}, {pipeline_mode = #tpu.pipeline_mode<synchronous>, transform_indices = @transform_5, window_bounds = array<i64: 32, 32>}, {pipeline_mode = #tpu.pipeline_mode<synchronous>, transform_indices = @transform_6, window_bounds = array<i64: 1, 32>}, {pipeline_mode = #tpu.pipeline_mode<synchronous>, transform_indices = @transform_7, window_bounds = array<i64: 32, 32>}, {pipeline_mode = #tpu.pipeline_mode<synchronous>, transform_indices = @transform_8, window_bounds = array<i64: 1, 32>}, {transform_indices = @transform_9, window_bounds = array<i64: 1, 8, 32>}]} {
    %c0 = arith.constant 0 : index
    %c0_0 = arith.constant 0 : index
    %c0_1 = arith.constant 0 : index
    %0 = vector.load %arg1[%c0, %c0_0, %c0_1] : memref<1x8x32xf32, #tpu.memory_space<vmem>>, vector<1x8x32xf32>
    %1 = vector.shape_cast %0 : vector<1x8x32xf32> to vector<8x32xf32>
    %2 = arith.truncf %1 : vector<8x32xf32> to vector<8x32xbf16>
    %c0_2 = arith.constant 0 : index
    %c0_3 = arith.constant 0 : index
    %3 = vector.load %arg2[%c0_2, %c0_3] : memref<32x32xf32, #tpu.memory_space<vmem>>, vector<32x32xf32>
    %4 = arith.truncf %3 : vector<32x32xf32> to vector<32x32xbf16>
    %cst = arith.constant dense<0.000000e+00> : vector<8x32xf32>
    %5 = tpu.matmul %2, %4, %cst {dimension_numbers = #tpu.dot_dimension_numbers<[1], [0], [0], [1], [0, 0, 1, 1], [], []>} : vector<8x32xbf16>, vector<32x32xbf16>, vector<8x32xf32> -> vector<8x32xf32>
    %c0_4 = arith.constant 0 : index
    %c0_5 = arith.constant 0 : index
    %6 = vector.load %arg3[%c0_4, %c0_5] : memref<1x32xf32, #tpu.memory_space<vmem>>, vector<1x32xf32>
    %7 = vector.broadcast %6 : vector<1x32xf32> to vector<8x32xf32>
    %8 = arith.addf %5, %7 : vector<8x32xf32>
    %cst_6 = arith.constant 0.353553385 : f32
    %9 = vector.broadcast %cst_6 : f32 to vector<8x32xf32>
    %10 = arith.mulf %8, %9 : vector<8x32xf32>
    %c0_7 = arith.constant 0 : index
    %c0_8 = arith.constant 0 : index
    %11 = vector.load %arg4[%c0_7, %c0_8] : memref<32x32xf32, #tpu.memory_space<vmem>>, vector<32x32xf32>
    %12 = arith.truncf %11 : vector<32x32xf32> to vector<32x32xbf16>
    %cst_9 = arith.constant dense<0.000000e+00> : vector<8x32xf32>
    %13 = tpu.matmul %2, %12, %cst_9 {dimension_numbers = #tpu.dot_dimension_numbers<[1], [0], [0], [1], [0, 0, 1, 1], [], []>} : vector<8x32xbf16>, vector<32x32xbf16>, vector<8x32xf32> -> vector<8x32xf32>
    %c0_10 = arith.constant 0 : index
    %c0_11 = arith.constant 0 : index
    %14 = vector.load %arg5[%c0_10, %c0_11] : memref<1x32xf32, #tpu.memory_space<vmem>>, vector<1x32xf32>
    %15 = vector.broadcast %14 : vector<1x32xf32> to vector<8x32xf32>
    %16 = arith.addf %13, %15 : vector<8x32xf32>
    %c0_12 = arith.constant 0 : index
    %c0_13 = arith.constant 0 : index
    %17 = vector.load %arg6[%c0_12, %c0_13] : memref<32x32xf32, #tpu.memory_space<vmem>>, vector<32x32xf32>
    %18 = arith.truncf %17 : vector<32x32xf32> to vector<32x32xbf16>
    %cst_14 = arith.constant dense<0.000000e+00> : vector<8x32xf32>
    %19 = tpu.matmul %2, %18, %cst_14 {dimension_numbers = #tpu.dot_dimension_numbers<[1], [0], [0], [1], [0, 0, 1, 1], [], []>} : vector<8x32xbf16>, vector<32x32xbf16>, vector<8x32xf32> -> vector<8x32xf32>
    %c0_15 = arith.constant 0 : index
    %c0_16 = arith.constant 0 : index
    %20 = vector.load %arg7[%c0_15, %c0_16] : memref<1x32xf32, #tpu.memory_space<vmem>>, vector<1x32xf32>
    %21 = vector.broadcast %20 : vector<1x32xf32> to vector<8x32xf32>
    %22 = arith.addf %19, %21 : vector<8x32xf32>
    %23 = vector.extract_strided_slice %10 {offsets = [0, 0], sizes = [8, 8], strides = [1, 1]} : vector<8x32xf32> to vector<8x8xf32>
    %24 = arith.truncf %23 : vector<8x8xf32> to vector<8x8xbf16>
    %25 = vector.extract_strided_slice %16 {offsets = [0, 0], sizes = [8, 8], strides = [1, 1]} : vector<8x32xf32> to vector<8x8xf32>
    %26 = arith.truncf %25 : vector<8x8xf32> to vector<8x8xbf16>
    %27 = vector.extract_strided_slice %22 {offsets = [0, 0], sizes = [8, 8], strides = [1, 1]} : vector<8x32xf32> to vector<8x8xf32>
    %28 = arith.truncf %27 : vector<8x8xf32> to vector<8x8xbf16>
    %cst_17 = arith.constant dense<0.000000e+00> : vector<8x8xf32>
    %29 = tpu.matmul %24, %26, %cst_17 {dimension_numbers = #tpu.dot_dimension_numbers<[1], [1], [0], [0], [0, 0, 1, 0], [], []>} : vector<8x8xbf16>, vector<8x8xbf16>, vector<8x8xf32> -> vector<8x8xf32>
    %cst_18 = arith.constant dense<0xFF800000> : vector<8xf32>
    %30 = vector.multi_reduction <maximumf>, %29, %cst_18 [1] : vector<8x8xf32> to vector<8xf32>
    %31 = vector.shape_cast %30 : vector<8xf32> to vector<8x1xf32>
    %32 = vector.broadcast %31 : vector<8x1xf32> to vector<8x8xf32>
    %33 = arith.subf %29, %32 : vector<8x8xf32>
    %34 = math.exp %33 : vector<8x8xf32>
    %cst_19 = arith.constant dense<0.000000e+00> : vector<8xf32>
    %35 = vector.multi_reduction <add>, %34, %cst_19 [1] : vector<8x8xf32> to vector<8xf32>
    %36 = vector.shape_cast %35 : vector<8xf32> to vector<8x1xf32>
    %37 = arith.truncf %34 : vector<8x8xf32> to vector<8x8xbf16>
    %cst_20 = arith.constant dense<0.000000e+00> : vector<8x8xf32>
    %38 = tpu.matmul %37, %28, %cst_20 {dimension_numbers = #tpu.dot_dimension_numbers<[1], [0], [0], [1], [0, 0, 1, 1], [], []>} : vector<8x8xbf16>, vector<8x8xbf16>, vector<8x8xf32> -> vector<8x8xf32>
    %39 = tpu.reciprocal %36 {approx = true} : vector<8x1xf32> -> vector<8x1xf32>
    %40 = vector.broadcast %39 : vector<8x1xf32> to vector<8x8xf32>
    %41 = arith.mulf %38, %40 : vector<8x8xf32>
    %42 = vector.extract_strided_slice %10 {offsets = [0, 8], sizes = [8, 8], strides = [1, 1]} : vector<8x32xf32> to vector<8x8xf32>
    %43 = arith.truncf %42 : vector<8x8xf32> to vector<8x8xbf16>
    %44 = vector.extract_strided_slice %16 {offsets = [0, 8], sizes = [8, 8], strides = [1, 1]} : vector<8x32xf32> to vector<8x8xf32>
    %45 = arith.truncf %44 : vector<8x8xf32> to vector<8x8xbf16>
    %46 = vector.extract_strided_slice %22 {offsets = [0, 8], sizes = [8, 8], strides = [1, 1]} : vector<8x32xf32> to vector<8x8xf32>
    %47 = arith.truncf %46 : vector<8x8xf32> to vector<8x8xbf16>
    %cst_21 = arith.constant dense<0.000000e+00> : vector<8x8xf32>
    %48 = tpu.matmul %43, %45, %cst_21 {dimension_numbers = #tpu.dot_dimension_numbers<[1], [1], [0], [0], [0, 0, 1, 0], [], []>} : vector<8x8xbf16>, vector<8x8xbf16>, vector<8x8xf32> -> vector<8x8xf32>
    %cst_22 = arith.constant dense<0xFF800000> : vector<8xf32>
    %49 = vector.multi_reduction <maximumf>, %48, %cst_22 [1] : vector<8x8xf32> to vector<8xf32>
    %50 = vector.shape_cast %49 : vector<8xf32> to vector<8x1xf32>
    %51 = vector.broadcast %50 : vector<8x1xf32> to vector<8x8xf32>
    %52 = arith.subf %48, %51 : vector<8x8xf32>
    %53 = math.exp %52 : vector<8x8xf32>
    %cst_23 = arith.constant dense<0.000000e+00> : vector<8xf32>
    %54 = vector.multi_reduction <add>, %53, %cst_23 [1] : vector<8x8xf32> to vector<8xf32>
    %55 = vector.shape_cast %54 : vector<8xf32> to vector<8x1xf32>
    %56 = arith.truncf %53 : vector<8x8xf32> to vector<8x8xbf16>
    %cst_24 = arith.constant dense<0.000000e+00> : vector<8x8xf32>
    %57 = tpu.matmul %56, %47, %cst_24 {dimension_numbers = #tpu.dot_dimension_numbers<[1], [0], [0], [1], [0, 0, 1, 1], [], []>} : vector<8x8xbf16>, vector<8x8xbf16>, vector<8x8xf32> -> vector<8x8xf32>
    %58 = tpu.reciprocal %55 {approx = true} : vector<8x1xf32> -> vector<8x1xf32>
    %59 = vector.broadcast %58 : vector<8x1xf32> to vector<8x8xf32>
    %60 = arith.mulf %57, %59 : vector<8x8xf32>
    %61 = vector.extract_strided_slice %10 {offsets = [0, 16], sizes = [8, 8], strides = [1, 1]} : vector<8x32xf32> to vector<8x8xf32>
    %62 = arith.truncf %61 : vector<8x8xf32> to vector<8x8xbf16>
    %63 = vector.extract_strided_slice %16 {offsets = [0, 16], sizes = [8, 8], strides = [1, 1]} : vector<8x32xf32> to vector<8x8xf32>
    %64 = arith.truncf %63 : vector<8x8xf32> to vector<8x8xbf16>
    %65 = vector.extract_strided_slice %22 {offsets = [0, 16], sizes = [8, 8], strides = [1, 1]} : vector<8x32xf32> to vector<8x8xf32>
    %66 = arith.truncf %65 : vector<8x8xf32> to vector<8x8xbf16>
    %cst_25 = arith.constant dense<0.000000e+00> : vector<8x8xf32>
    %67 = tpu.matmul %62, %64, %cst_25 {dimension_numbers = #tpu.dot_dimension_numbers<[1], [1], [0], [0], [0, 0, 1, 0], [], []>} : vector<8x8xbf16>, vector<8x8xbf16>, vector<8x8xf32> -> vector<8x8xf32>
    %cst_26 = arith.constant dense<0xFF800000> : vector<8xf32>
    %68 = vector.multi_reduction <maximumf>, %67, %cst_26 [1] : vector<8x8xf32> to vector<8xf32>
    %69 = vector.shape_cast %68 : vector<8xf32> to vector<8x1xf32>
    %70 = vector.broadcast %69 : vector<8x1xf32> to vector<8x8xf32>
    %71 = arith.subf %67, %70 : vector<8x8xf32>
    %72 = math.exp %71 : vector<8x8xf32>
    %cst_27 = arith.constant dense<0.000000e+00> : vector<8xf32>
    %73 = vector.multi_reduction <add>, %72, %cst_27 [1] : vector<8x8xf32> to vector<8xf32>
    %74 = vector.shape_cast %73 : vector<8xf32> to vector<8x1xf32>
    %75 = arith.truncf %72 : vector<8x8xf32> to vector<8x8xbf16>
    %cst_28 = arith.constant dense<0.000000e+00> : vector<8x8xf32>
    %76 = tpu.matmul %75, %66, %cst_28 {dimension_numbers = #tpu.dot_dimension_numbers<[1], [0], [0], [1], [0, 0, 1, 1], [], []>} : vector<8x8xbf16>, vector<8x8xbf16>, vector<8x8xf32> -> vector<8x8xf32>
    %77 = tpu.reciprocal %74 {approx = true} : vector<8x1xf32> -> vector<8x1xf32>
    %78 = vector.broadcast %77 : vector<8x1xf32> to vector<8x8xf32>
    %79 = arith.mulf %76, %78 : vector<8x8xf32>
    %80 = vector.extract_strided_slice %10 {offsets = [0, 24], sizes = [8, 8], strides = [1, 1]} : vector<8x32xf32> to vector<8x8xf32>
    %81 = arith.truncf %80 : vector<8x8xf32> to vector<8x8xbf16>
    %82 = vector.extract_strided_slice %16 {offsets = [0, 24], sizes = [8, 8], strides = [1, 1]} : vector<8x32xf32> to vector<8x8xf32>
    %83 = arith.truncf %82 : vector<8x8xf32> to vector<8x8xbf16>
    %84 = vector.extract_strided_slice %22 {offsets = [0, 24], sizes = [8, 8], strides = [1, 1]} : vector<8x32xf32> to vector<8x8xf32>
    %85 = arith.truncf %84 : vector<8x8xf32> to vector<8x8xbf16>
    %cst_29 = arith.constant dense<0.000000e+00> : vector<8x8xf32>
    %86 = tpu.matmul %81, %83, %cst_29 {dimension_numbers = #tpu.dot_dimension_numbers<[1], [1], [0], [0], [0, 0, 1, 0], [], []>} : vector<8x8xbf16>, vector<8x8xbf16>, vector<8x8xf32> -> vector<8x8xf32>
    %cst_30 = arith.constant dense<0xFF800000> : vector<8xf32>
    %87 = vector.multi_reduction <maximumf>, %86, %cst_30 [1] : vector<8x8xf32> to vector<8xf32>
    %88 = vector.shape_cast %87 : vector<8xf32> to vector<8x1xf32>
    %89 = vector.broadcast %88 : vector<8x1xf32> to vector<8x8xf32>
    %90 = arith.subf %86, %89 : vector<8x8xf32>
    %91 = math.exp %90 : vector<8x8xf32>
    %cst_31 = arith.constant dense<0.000000e+00> : vector<8xf32>
    %92 = vector.multi_reduction <add>, %91, %cst_31 [1] : vector<8x8xf32> to vector<8xf32>
    %93 = vector.shape_cast %92 : vector<8xf32> to vector<8x1xf32>
    %94 = arith.truncf %91 : vector<8x8xf32> to vector<8x8xbf16>
    %cst_32 = arith.constant dense<0.000000e+00> : vector<8x8xf32>
    %95 = tpu.matmul %94, %85, %cst_32 {dimension_numbers = #tpu.dot_dimension_numbers<[1], [0], [0], [1], [0, 0, 1, 1], [], []>} : vector<8x8xbf16>, vector<8x8xbf16>, vector<8x8xf32> -> vector<8x8xf32>
    %96 = tpu.reciprocal %93 {approx = true} : vector<8x1xf32> -> vector<8x1xf32>
    %97 = vector.broadcast %96 : vector<8x1xf32> to vector<8x8xf32>
    %98 = arith.mulf %95, %97 : vector<8x8xf32>
    %99 = tpu.concatenate %41, %60, %79, %98 in 1 : vector<8x8xf32>, vector<8x8xf32>, vector<8x8xf32>, vector<8x8xf32> -> vector<8x32xf32>
    %100 = arith.truncf %99 : vector<8x32xf32> to vector<8x32xbf16>
    %c0_33 = arith.constant 0 : index
    %c0_34 = arith.constant 0 : index
    %101 = vector.load %arg8[%c0_33, %c0_34] : memref<32x32xf32, #tpu.memory_space<vmem>>, vector<32x32xf32>
    %102 = arith.truncf %101 : vector<32x32xf32> to vector<32x32xbf16>
    %cst_35 = arith.constant dense<0.000000e+00> : vector<8x32xf32>
    %103 = tpu.matmul %100, %102, %cst_35 {dimension_numbers = #tpu.dot_dimension_numbers<[1], [0], [0], [1], [0, 0, 1, 1], [], []>} : vector<8x32xbf16>, vector<32x32xbf16>, vector<8x32xf32> -> vector<8x32xf32>
    %c0_36 = arith.constant 0 : index
    %c0_37 = arith.constant 0 : index
    %104 = vector.load %arg9[%c0_36, %c0_37] : memref<1x32xf32, #tpu.memory_space<vmem>>, vector<1x32xf32>
    %105 = vector.broadcast %104 : vector<1x32xf32> to vector<8x32xf32>
    %106 = arith.addf %103, %105 : vector<8x32xf32>
    %c0_38 = arith.constant 0 : index
    %c0_39 = arith.constant 0 : index
    %c0_40 = arith.constant 0 : index
    %107 = vector.load %arg10[%c0_38, %c0_39, %c0_40] : memref<1x8x32xf32, #tpu.memory_space<vmem>>, vector<1x8x32xf32>
    %108 = vector.shape_cast %107 : vector<1x8x32xf32> to vector<8x32xf32>
    %109 = vector.shape_cast %106 : vector<8x32xf32> to vector<1x8x32xf32>
    tpu.vector_store %arg10[%c0_38, %c0_39, %c0_40], %109 {strides = array<i32>} : memref<1x8x32xf32, #tpu.memory_space<vmem>>, vector<1x8x32xf32>,
    return
  }
  func.func @transform_0(%arg0: i32) -> (i32, i32, i32) {
    %c0_i32 = arith.constant 0 : i32
    %c0_i32_0 = arith.constant 0 : i32
    %c0_i32_1 = arith.constant 0 : i32
    return %arg0, %c0_i32, %c0_i32_0 : i32, i32, i32
  }
  func.func @transform_1(%arg0: i32) -> (i32, i32) {
    %c0_i32 = arith.constant 0 : i32
    %c0_i32_0 = arith.constant 0 : i32
    %c0_i32_1 = arith.constant 0 : i32
    return %c0_i32, %c0_i32_0 : i32, i32
  }
  func.func @transform_2(%arg0: i32) -> (i32, i32) {
    %c0_i32 = arith.constant 0 : i32
    %c0_i32_0 = arith.constant 0 : i32
    %c0_i32_1 = arith.constant 0 : i32
    return %c0_i32, %c0_i32_0 : i32, i32
  }
  func.func @transform_3(%arg0: i32) -> (i32, i32) {
    %c0_i32 = arith.constant 0 : i32
    %c0_i32_0 = arith.constant 0 : i32
    %c0_i32_1 = arith.constant 0 : i32
    return %c0_i32, %c0_i32_0 : i32, i32
  }
  func.func @transform_4(%arg0: i32) -> (i32, i32) {
    %c0_i32 = arith.constant 0 : i32
    %c0_i32_0 = arith.constant 0 : i32
    %c0_i32_1 = arith.constant 0 : i32
    return %c0_i32, %c0_i32_0 : i32, i32
  }
  func.func @transform_5(%arg0: i32) -> (i32, i32) {
    %c0_i32 = arith.constant 0 : i32
    %c0_i32_0 = arith.constant 0 : i32
    %c0_i32_1 = arith.constant 0 : i32
    return %c0_i32, %c0_i32_0 : i32, i32
  }
  func.func @transform_6(%arg0: i32) -> (i32, i32) {
    %c0_i32 = arith.constant 0 : i32
    %c0_i32_0 = arith.constant 0 : i32
    %c0_i32_1 = arith.constant 0 : i32
    return %c0_i32, %c0_i32_0 : i32, i32
  }
  func.func @transform_7(%arg0: i32) -> (i32, i32) {
    %c0_i32 = arith.constant 0 : i32
    %c0_i32_0 = arith.constant 0 : i32
    %c0_i32_1 = arith.constant 0 : i32
    return %c0_i32, %c0_i32_0 : i32, i32
  }
  func.func @transform_8(%arg0: i32) -> (i32, i32) {
    %c0_i32 = arith.constant 0 : i32
    %c0_i32_0 = arith.constant 0 : i32
    %c0_i32_1 = arith.constant 0 : i32
    return %c0_i32, %c0_i32_0 : i32, i32
  }
  func.func @transform_9(%arg0: i32) -> (i32, i32, i32) {
    %c0_i32 = arith.constant 0 : i32
    %c0_i32_0 = arith.constant 0 : i32
    %c0_i32_1 = arith.constant 0 : i32
    return %arg0, %c0_i32, %c0_i32_0 : i32, i32, i32
  }
}

</mosaic_0001>

<bundles_post_ra>
// kernel: tpu_custom_call.1
= control target key start
LH: loop header
LB: loop body
LE: loop exit
PB: predicated region body
PF: predicated region fallthrough
CT: control target
= control target key end

     0   :  { %s2140_s0 = inlined_call_operand.hbm [shape: f32[2,8,32], index: 0, kind: input, shape index: {}]   ;;  %s2141_s1 = inlined_call_operand.hbm [shape: f32[32,32], index: 1, kind: input, shape index: {}]   ;;  %s2142_s2 = inlined_call_operand.vmem [shape: f32[1,32], index: 2, kind: input, shape index: {}]   ;;  %s2143_s3 = inlined_call_operand.hbm [shape: f32[32,32], index: 3, kind: input, shape index: {}]   ;;  %s2144_s4 = inlined_call_operand.vmem [shape: f32[1,32], index: 4, kind: input, shape index: {}]   ;;  %s2145_s5 = inlined_call_operand.hbm [shape: f32[32,32], index: 5, kind: input, shape index: {}]   ;;  %s2146_s6 = inlined_call_operand.vmem [shape: f32[1,32], index: 6, kind: input, shape index: {}]   ;;  %s2147_s7 = inlined_call_operand.hbm [shape: f32[32,32], index: 7, kind: input, shape index: {}]   ;;  %s2148_s8 = inlined_call_operand.vmem [shape: f32[1,32], index: 8, kind: input, shape index: {}]   ;;  %s2149_s9 = inlined_call_operand.hbm [shape: f32[2,8,32], index: 9, kind: output, shape index: {}]  }
   0x1   :  { %2154 = sst [smem:[#allocation16_spill]] %s2141_s1 }
   0x2   :  { %2155 = sst [smem:[#allocation17_spill]] %s2149_s9 }
   0x3   :  { %14 = vsyncpa [#allocation3], 0 }
   0x4   :  { %16 = vsyncpa [#allocation3 + $0x1], 0 }
   0x5   :  { %17 = vsyncpa [#allocation6], 0 }
   0x6   :  { %18 = vsyncpa [#allocation9], 0 }
   0x7   :  { %19 = vsyncpa [#allocation4], 0 }
   0x8   :  { %21 = vsyncpa [#allocation4 + $0x1], 0  ;;  %s1753_s30 = smov 0   ;;  %s1755_s10 = smov 0  }
   0x9   :  { %s1757_s11 = smov 0   ;;  %s1759_s12 = smov 0  }
   0xa LB: > { %s1687_s13 = smov [#allocation5]   ;;  %s1774_s15 = sadd.s32 4294967295, %s1685_s12   ;;  %s1685_s12 = sphi %s1759_s12, %s2178_s12   ;;  %s1681_s11 = sphi %s1757_s11, %s2177_s11   ;;  %s1677_s10 = sphi %s1755_s10, %s2176_s10   ;;  %s1673_s30 = sphi %s1753_s30, %s2175_s30  }
   0xb   : > { %s264_s14 = sshll.u32 %s1687_s13, 4  ;;  %p1213_p0 = scmp.ge.s32.totalorder %s1685_s12, 1  ;;  %s1779_s14 = int_to_ptr.vmem [resolvable:$true] %s264_s14 }
   0xc   : > { %p2151_p1 = scmp.eq.s32.totalorder %s1774_s15, 0  ;;  %p252_p2 = scmp.lt.s32.totalorder %s1685_s12, 3 }
   0xd   : > { %s1688_s17 = smov [#allocation8]   ;;  %s1689_s20 = smov [#allocation7]  }
   0xe   : > { %p1781_p3 = pnand %p1213_p0, %p252_p2  ;;  %s296_s18 = sshll.u32 %s1688_s17, 4  ;;  %s1794_s18 = int_to_ptr.vmem [resolvable:$true] %s296_s18 }
   0xf   : > { %s280_s21 = sshll.u32 %s1689_s20, 4  ;;  %s2158_s1 = sld [smem:[#allocation16_spill]]  ;;  %s1796_s21 = int_to_ptr.vmem [resolvable:$true] %s280_s21 }
  0x10   : > { %s2156_s16 = scalar_select %p1781_p3, 1, 0 }
  0x11   : > { %p1376_p5 = pneg %p1781_p3 }
  0x13   : > { %p1790_p6 = pnand %p1376_p5, %p2151_p1 }
  0x15   : > { %s1469_s24 = scalar_lea.hbm %s2158_s1, 512  ;;  %p1806_p8 = pneg %p1790_p6 }
  0x16   : > { %p1470_p7 = scmp.ne.s32.totalorder %s2158_s1, %s1469_s24  ;;  %p1476_p11 = scmp.lt.u32.totalorder %s1469_s24, %s2158_s1 }
  0x18   : > { %p1472_p9 = pnand %p1806_p8, %p1470_p7 }
  0x1a   : > { %p1473_p10 = pneg %p1472_p9 }
  0x1c   : > { %p1478_p12 = pnand %p1476_p11, %p1473_p10 }
  0x1e   : > { %1481 = shalt.err (!%p1478_p12)
}
  0x1f   : > { %s1482_s13 = scalar_lea.vmem %s1779_s14, 512  ;;  %p1490_p5 = scmp.lt.s32.totalorder %s1779_s14, %s1779_s14 }
  0x20   : > { %p1483_p13 = scmp.ne.s32.totalorder %s1779_s14, %s1482_s13  ;;  %p1491_p4 = scmp.lt.s32.totalorder %s1482_s13, %s1482_s13 }
  0x22   : > { %p1485_p0 = pnand %p1483_p13, %p1806_p8  ;;  %p1492_p7 = por %p1491_p4, %p1490_p5 }
  0x24   : > { %p1486_p2 = pneg %p1485_p0 }
  0x26   : > { %p1493_p9 = pnand %p1492_p7, %p1486_p2 }
  0x28   : > { %1496 = shalt.err (!%p1493_p9)
}
  0x29   : > { %s1690_s17 = smov 128   ;;  %s1691_s20 = smov 8  }
  0x2a   : > { %1379 = dma.hbm_to_vmem [thread:$0]  (!%p1790_p6), %s2158_s1, 512, %s1779_s14, [#allocation6], %s1690_s17, %s1690_s17, %s1691_s20  }
  0x2b   : > { %s1497_s26 = scalar_lea.hbm %s2145_s5, 512 }
  0x2c   : > { %p1498_p4 = scmp.ne.s32.totalorder %s2145_s5, %s1497_s26  ;;  %p1504_p12 = scmp.lt.u32.totalorder %s1497_s26, %s2145_s5 }
  0x2e   : > { %p1500_p10 = pnand %p1498_p4, %p1806_p8 }
  0x30   : > { %p1501_p11 = pneg %p1500_p10 }
  0x32   : > { %p1506_p13 = pnand %p1504_p12, %p1501_p11 }
  0x34   : > { %1509 = shalt.err (!%p1506_p13)
}
  0x35   : > { %s1510_s14 = scalar_lea.vmem %s1794_s18, 512  ;;  %p1518_p7 = scmp.lt.s32.totalorder %s1794_s18, %s1794_s18 }
  0x36   : > { %p1511_p0 = scmp.ne.s32.totalorder %s1794_s18, %s1510_s14  ;;  %p1519_p9 = scmp.lt.s32.totalorder %s1510_s14, %s1510_s14 }
  0x38   : > { %p1513_p2 = pnand %p1511_p0, %p1806_p8  ;;  %p1520_p4 = por %p1519_p9, %p1518_p7 }
  0x3a   : > { %p1514_p5 = pneg %p1513_p2 }
  0x3c   : > { %p1521_p10 = pnand %p1520_p4, %p1514_p5 }
  0x3e   : > { %1524 = shalt.err (!%p1521_p10)
}
  0x3f   : > { %1385 = dma.hbm_to_vmem [thread:$0]  (!%p1790_p6), %s2145_s5, 512, %s1794_s18, [#allocation9], %s1690_s17, %s1690_s17, %s1691_s20  }
  0x40   : > { %s1525_s25 = scalar_lea.hbm %s2143_s3, 512 }
  0x41   : > { %p1526_p11 = scmp.ne.s32.totalorder %s2143_s3, %s1525_s25  ;;  %p1532_p0 = scmp.lt.u32.totalorder %s1525_s25, %s2143_s3 }
  0x43   : > { %p1528_p12 = pnand %p1526_p11, %p1806_p8 }
  0x45   : > { %p1529_p13 = pneg %p1528_p12 }
  0x47   : > { %p1534_p2 = pnand %p1532_p0, %p1529_p13 }
  0x49   : > { %1537 = shalt.err (!%p1534_p2)
}
  0x4a   : > { %s1538_s18 = scalar_lea.vmem %s1796_s21, 512  ;;  %p1546_p4 = scmp.lt.s32.totalorder %s1796_s21, %s1796_s21 }
  0x4b   : > { %p1539_p5 = scmp.ne.s32.totalorder %s1796_s21, %s1538_s18  ;;  %p1547_p10 = scmp.lt.s32.totalorder %s1538_s18, %s1538_s18 }
  0x4d   : > { %p1541_p7 = pnand %p1539_p5, %p1806_p8  ;;  %p1548_p11 = por %p1547_p10, %p1546_p4 }
  0x4f   : > { %p1542_p9 = pneg %p1541_p7 }
  0x51   : > { %p1549_p12 = pnand %p1548_p11, %p1542_p9 }
  0x53   : > { %1552 = shalt.err (!%p1549_p12)
}
  0x54   : > { %1382 = dma.hbm_to_vmem [thread:$0]  (!%p1790_p6), %s2143_s3, 512, %s1796_s21, [#allocation6], %s1690_s17, %s1690_s17, %s1691_s20  }
  0x55   : > { %s1692_s22 = smov [#allocation10]   ;;  %s1553_s26 = scalar_lea.hbm %s2147_s7, 512 }
  0x56   : > { %s312_s23 = sshll.u32 %s1692_s22, 4  ;;  %p1554_p13 = scmp.ne.s32.totalorder %s2147_s7, %s1553_s26  ;;  %s313_s23 = int_to_ptr.vmem [resolvable:$true] %s312_s23 }
  0x57   : > { %p1560_p5 = scmp.lt.u32.totalorder %s1553_s26, %s2147_s7 }
  0x58   : > { %p1556_p0 = pnand %p1554_p13, %p1806_p8 }
  0x5a   : > { %p1557_p2 = pneg %p1556_p0 }
  0x5c   : > { %p1562_p7 = pnand %p1560_p5, %p1557_p2 }
  0x5e   : > { %1565 = shalt.err (!%p1562_p7)
}
  0x5f   : > { %s1566_s21 = scalar_lea.vmem %s313_s23, 512  ;;  %p1574_p11 = scmp.lt.s32.totalorder %s313_s23, %s313_s23 }
  0x60   : > { %p1567_p9 = scmp.ne.s32.totalorder %s313_s23, %s1566_s21  ;;  %p1575_p12 = scmp.lt.s32.totalorder %s1566_s21, %s1566_s21 }
  0x62   : > { %p1569_p4 = pnand %p1567_p9, %p1806_p8  ;;  %p1576_p1 = por %p1575_p12, %p1574_p11 }
  0x64   : > { %p1570_p10 = pneg %p1569_p4 }
  0x66   : > { %p1577_p3 = pnand %p1576_p1, %p1570_p10 }
  0x68   : > { %1580 = shalt.err (!%p1577_p3)
}
  0x69   : > { %1388 = dma.hbm_to_vmem [thread:$0]  (!%p1790_p6), %s2147_s7, 512, %s313_s23, [#allocation9], %s1690_s17, %s1690_s17, %s1691_s20  }
  0x6a   : > { %s1212_s19 = sadd.s32 4294967294, %s1685_s12   ;;  %s1905_s27 = sadd.s32 1, %s1685_s12  }
  0x6b   : > { %s31_s22 = ssub.s32 %s1685_s12, %s1905_s27  ;;  %s34_s24 = sadd.s32 1, %s1681_s11 }
  0x6c   : > { %p32_p1 = scmp.eq.s32.totalorder %s31_s22, 0  ;;  %p41_p3 = scmp.ne.s32.totalorder %s1681_s11, %s1677_s10 }
  0x6d   : > { %p42_p8 = scmp.eq.s32.totalorder %s1685_s12, 0  ;;  %p47_p13 = scmp.ne.s32.totalorder %s1677_s10, %s1673_s30 }
  0x6e   : > { %s1916_s25 = scalar_select %p32_p1, %s1681_s11, %s34_s24  }
  0x6f   : > { %p1918_p0 = por %p42_p8, %p41_p3  ;;  %p2161_p2 = scmp.eq.s32.totalorder %s1774_s15, 0 }
  0x70   : > { %p239_p5 = scmp.eq.s32.totalorder %s1774_s15, 1  ;;  %p245_p7 = scmp.eq.s32.totalorder %s1212_s19, 1 }
  0x71   : > { %p1924_p6 = por %p2161_p2, %p47_p13  ;;  %p1401_p9 = scmp.lt.s32.totalorder %s1685_s12, 2 }
  0x72   : > { %s329_s20 = sand.u32 1, %s1681_s11   ;;  %p1931_p4 = por %p239_p5, %p41_p3 }
  0x73   : > { %p1935_p10 = por %p245_p7, %p47_p13  ;;  %s1219_s29 = sshll.u32 %s329_s20, 3 }
  0x74   : > { %s2163_s23 = scalar_select %p1931_p4, 1, 0 }
  0x75   : > { %s2164_s28 = scalar_select %p1935_p10, 1, 0 }
  0x76   : > { %s1220_s13 = sshll.u32 %s1685_s12, 7  ;;  %s333_s9 = scalar_lea.vmem [#allocation2], %s1219_s29 }
  0x77   : > { %s1943_s14 = scalar_lea.hbm %s2140_s0, %s1220_s13  ;;  %s340_s19 = sshll.u32 %s333_s9, 4  ;;  %s1945_s19 = int_to_ptr.vmem [resolvable:$true] %s340_s19 }
  0x78   : > { %p1949_p11 = pnand %p1401_p9, %p1918_p0  ;;  %s330_s24 = scalar_lea.sflag [#allocation3], %s329_s20 }
  0x79   : > { %s1581_s1 = scalar_lea.hbm %s1943_s14, 128  ;;  %s1586_s18 = scalar_lea.hbm %s2140_s0, 256 }
  0x7a   : > { %p1582_p12 = scmp.ne.s32.totalorder %s1943_s14, %s1581_s1  ;;  %p1583_p1 = pneg %p1949_p11 }
  0x7b   : > { %p1587_p13 = scmp.lt.u32.totalorder %s1943_s14, %s2140_s0  ;;  %p1588_p0 = scmp.lt.u32.totalorder %s1586_s18, %s1581_s1 }
  0x7c   : > { %p1584_p3 = pnand %p1583_p1, %p1582_p12  ;;  %p1590_p5 = scmp.lt.u32.totalorder %s1581_s1, %s1943_s14 }
  0x7d   : > { %p1589_p2 = por %p1588_p0, %p1587_p13 }
  0x7e   : > { %p1585_p8 = pneg %p1584_p3 }
  0x7f   : > { %p1591_p7 = por %p1590_p5, %p1589_p2 }
  0x81   : > { %p1592_p9 = pnand %p1591_p7, %p1585_p8 }
  0x83   : > { %1595 = shalt.err (!%p1592_p9)
}
  0x84   : > { %s1596_s20 = scalar_lea.vmem %s1945_s19, 128  ;;  %s1693_s9 = smov [#allocation2]  }
  0x85   : > { %p1597_p12 = scmp.ne.s32.totalorder %s1945_s19, %s1596_s20  ;;  %s1601_s29 = sshll.u32 %s1693_s9, 4  ;;  %s1602_s29 = int_to_ptr.vmem [resolvable:$false] %s1601_s29 }
  0x86   : > { %s1603_s13 = scalar_lea.vmem %s1602_s29, 256  ;;  %p1604_p4 = scmp.lt.s32.totalorder %s1945_s19, %s1602_s29 }
  0x87   : > { %p1599_p3 = pnand %p1597_p12, %p1583_p1  ;;  %p1605_p13 = scmp.lt.s32.totalorder %s1603_s13, %s1596_s20 }
  0x89   : > { %p1600_p10 = pneg %p1599_p3  ;;  %p1606_p0 = por %p1605_p13, %p1604_p4 }
  0x8b   : > { %p1607_p2 = pnand %p1606_p0, %p1600_p10 }
  0x8d   : > { %1610 = shalt.err (!%p1607_p2)
}
  0x8e   : > { %1392 = dma.hbm_to_vmem [thread:$0]  (!%p1949_p11), %s1943_s14, 128, %s1945_s19, %s330_s24  }
  0x8f   : > { %p2166_p8 = scmp.ne.s32.totalorder %s2156_s16, 0 }
  0x90   : > { %s1981_s1 = sand.u32 (!%p2166_p8), 1, %s1677_s10  }
  0x91   : > { %349 = sbr.rel (%p2166_p8) target bundleno = 1456 (0x5b0), region = 56  ;;  %s1222_s18 = sshll.u32 (!%p2166_p8), %s1981_s1, 3 }
  0x92   : > { %s352_s26 = scalar_lea.sflag (!%p2166_p8), [#allocation3], %s1981_s1  ;;  %s355_s21 = scalar_lea.vmem (!%p2166_p8), [#allocation2], %s1222_s18 }
  0x98   : > { %1656 = dma.done.wait (%p1924_p6), %s352_s26, 128  }
  0x99   : > { %1658 = vsyncadd (%p1924_p6), %s352_s26, 4294967168  ;;  %p2167_p4 = scmp.eq.s32.totalorder %s1774_s15, 0 }
  0x9b   : > { %1660 = dma.done.wait (%p2167_p4), [#allocation6], 1024   ;;  %p2168_p10 = pmov %p2167_p4 }
  0x9c   : > { %p2169_p11 = pmov %p2167_p4 }
  0x9d   : > { %1662 = vsyncadd (%p2168_p10), [#allocation6], 4294966272 }
  0x9e   : > { %1664 = dma.done.wait (%p2169_p11), [#allocation9], 1024   ;;  %p2170_p1 = pmov %p2167_p4 }
  0x9f   : > { %v1694_v0 = vmov 0.0   ;;  %vm1695_vm0 = vmmov 0   ;;  %v467_v1 = vld [vmem:[#allocation7] sm:$0xff]  ;;  %v468_v2 = vld [vmem:[#allocation7 + $0x8] sm:$0xff]  ;;  %v469_v6 = vld [vmem:[#allocation7 + $0x10] sm:$0xff]  ;;  %vm422_vm1 = vcmask 261120  }
  0xa0   : > { %1666 = vsyncadd (%p2170_p1), [#allocation9], 4294966272  ;;  %1284 = vmatprep.subr.bf16.mxu1 %v1694_v0  ;;  %1276 = vmatprep.subr.bf16.mxu0 %v1694_v0  ;;  %v409_v3 = vld [vmem:[#allocation5] sm:$0xff]  ;;  %v471_v4 = vpack.c.bf16 %v468_v2, %v467_v1  ;;  %v410_v5 = vld [vmem:[#allocation5 + $0x8] sm:$0xff]  ;;  %vm576_vm2 = vcmask 64512   ;;  %s1696_s22 = smov 112  }
  0xa1   : > { %1288 = vmatprep.mubr.msk.bf16.mxu1 %vm1695_vm0, %v1694_v0  ;;  %1280 = vmatprep.mubr.msk.bf16.mxu0 %vm1695_vm0, %v1694_v0  ;;  %v470_v7 = vld [vmem:[#allocation7 + $0x18] sm:$0xff]  ;;  %v413_v8 = vpack.c.bf16 %v410_v5, %v409_v3  ;;  %v411_v9 = vld [vmem:[#allocation5 + $0x10] sm:$0xff]  ;;  %s1697_s24 = smov 120   ;;  %s1698_s20 = smov 104   ;;  %v520_v31 = vld [vmem:[#allocation8] sm:$0xff]  ;;  %vm636_vm3 = vcmask 1043456  }
  0xa2   : > { %v412_v10 = vld [vmem:[#allocation5 + $0x18] sm:$0xff]  ;;  %1285 = vmatpush3.bf16.msra.mxu1 %v471_v4  ;;  %v472_v11 = vpack.c.bf16 %v470_v7, %v469_v6  ;;  %v1230_v15 = vld [vmem:[%s2144_s4] ss:$0 sm:$0xff]  ;;  %v521_v32 = vld [vmem:[#allocation8 + $0x8] sm:$0xff]  ;;  %s1699_s13 = smov 8   ;;  %s1700_s26 = smov 16  }
  0xa3   : > { %v407_v12 = vld [vmem:[%s355_s21] sm:$0xff]  ;;  %1277 = vmatpush3.bf16.msra.mxu0 %v413_v8  ;;  %1286 = vmatprep.subr.bf16.mxu1 %v1694_v0  ;;  %v414_v13 = vpack.c.bf16 %v412_v10, %v411_v9  ;;  %v524_v34 = vpack.c.bf16 %v521_v32, %v520_v31  ;;  %s1701_s21 = smov 24   ;;  %vm1028_vm4 = vcmask 130048   ;;  %vm1030_vm5 = vcmask 195584   ;;  %s1245_s14 = sshll.u32 %s1774_s15, 7 }
  0xa4   : > { %1278 = vmatprep.subr.bf16.mxu0 %v1694_v0  ;;  %v408_v14 = vpack.c.bf16 %v407_v12, %v407_v12  ;;  %v1228_v16 = vld [vmem:[%s2142_s2] ss:$0 sm:$0xff]  ;;  %v523_v35 = vld [vmem:[#allocation8 + $0x18] sm:$0xff]  ;;  %s405_s19 = scalar_lea.vmem [#allocation11], %s1222_s18  ;;  %s2171_s9 = sld [smem:[#allocation17_spill]] }
  0xa5   : > { %v522_v33 = vld [vmem:[#allocation8 + $0x10] sm:$0xff]  ;;  %s1091_s15 = scalar_lea.sflag [#allocation4], %s1981_s1  ;;  %p2172_p5 = scmp.ne.s32.totalorder %s2163_s23, 0 }
  0xa6   : > { %1287 = vmatpush3.bf16.msra.mxu1 %v472_v11  ;;  %v525_v36 = vpack.c.bf16 %v523_v35, %v522_v33  ;;  %v1232_v51 = vld [vmem:[%s2146_s6] ss:$0 sm:$0xff] }
  0xa7   : > { %1279 = vmatpush3.bf16.msra.mxu0 %v414_v13  ;;  %1300 = vmatprep.subr.bf16.mxu1 %v1694_v0 }
  0xa8   : > { %1292 = vmatprep.subr.bf16.mxu0 %v1694_v0 }
  0xa9   : > { %1289 = vmatmul.mubr.msk.bf16.vlgmr.msra.gmra.mrb[0].mxu1 %vm422_vm1, %v408_v14 }
  0xaa   : > { %1281 = vmatmul.mubr.msk.bf16.vlgmr.msra.gmra.mrb[0].mxu0 %vm422_vm1, %v408_v14  ;;  %1302 = vmatprep.mubr.msk.bf16.mxu1 %vm1695_vm0, %v1694_v0  ;;  %s2095_s29 = scalar_lea.hbm %s2171_s9, %s1245_s14 }
  0xab   : > { %1296 = vmatprep.mubr.msk.bf16.mxu0 %vm1695_vm0, %v1694_v0  ;;  %1293 = vmatpush3.bf16.msra.mxu0 %v524_v34 }
  0xac   : > { %1294 = vmatprep.subr.bf16.mxu0 %v1694_v0 }
  0xaf   : > { %1295 = vmatpush3.bf16.msra.mxu0 %v525_v36 }
  0xb0   : > { %1306 = vmatprep.subr.bf16.mxu0 %v1694_v0 }
  0xb2   : > { %1297 = vmatmul.mubr.msk.bf16.vlgmr.msra.gmra.mrb[4].mxu0 %vm422_vm1, %v408_v14 }
  0xb3   : > { %1308 = vmatprep.mubr.msk.bf16.mxu0 %vm1695_vm0, %v1694_v0 }
 0x17c   : > { %v514_v17 = vpop.f32.mrb[0].mxu1 }
 0x17d   : > { %v515_v18 = vadd.f32 %v1230_v15, %v514_v17  ;;  %v1290_v19 = vpop.f32.mrb[1].mxu1  ;;  %v460_v20 = vpop.f32.mrb[0].mxu0 }
 0x17e   : > { %v461_v21 = vadd.f32 %v1228_v16, %v460_v20  ;;  %v517_v22 = vpop.f32.mrb[2].mxu1  ;;  %v1282_v23 = vpop.f32.mrb[1].mxu0 }
 0x17f   : > { %v574_v24 = vpack.c.bf16 %v515_v18, %v515_v18  ;;  %v1291_v25 = vpop.f32.mrb[3].mxu1  ;;  %v463_v26 = vpop.f32.mrb[2].mxu0 }
 0x180   : > { %v466_v27 = vmul.f32 0.35355338, %v461_v21  ;;  %v1283_v28 = vpop.f32.mrb[3].mxu0 }
 0x181   : > { %797 = vrot.lane.b32.xlu1 %v574_v24, %s1696_s22  ;;  %686 = vrot.lane.b32.xlu0 %v574_v24, %s1697_s24  ;;  %v581_v29 = vsel %vm576_vm2, %v574_v24, 0 }
 0x182   : > { %v573_v30 = vpack.c.bf16 %v466_v27, %v466_v27  ;;  %1301 = vmatpush3.bf16.xpose.msra.mxu1 %v581_v29 }
 0x183   : > { %1312 = vmatprep.subr.bf16.mxu1 %v1694_v0 }
 0x185   : > { %795 = vrot.lane.b32.xlu1 %v573_v30, %s1696_s22  ;;  %683 = vrot.lane.b32.xlu0 %v573_v30, %s1697_s24  ;;  %v567_v52 = vpop.f32.mrb[4].mxu0 }
 0x186   : > { %v568_v53 = vadd.f32 %v1232_v51, %v567_v52  ;;  %v1298_v54 = vpop.f32.mrb[5].mxu0 }
 0x187   : > { %v570_v55 = vpop.f32.mrb[6].mxu0 }
 0x188   : > { %v1299_v56 = vpop.f32.mrb[7].mxu0  ;;  %v575_v57 = vpack.c.bf16 %v568_v53, %v568_v53 }
 0x189   : > { %905 = vrot.lane.b32.xlu1 %v573_v30, %s1698_s20  ;;  %907 = vrot.lane.b32.xlu0 %v574_v24, %s1698_s20 }
 0x18a   : > { %1303 = vmatmul.mubr.msk.bf16.vlgmr.msra.gmra.mrb[4].mxu1 %vm576_vm2, %v573_v30  ;;  %v638_v58 = vsel %vm636_vm3, %v575_v57, 0 }
 0x18b   : > { %1314 = vmatprep.mubr.msk.bf16.mxu1 %vm1695_vm0, %v1694_v0  ;;  %1307 = vmatpush3.bf16.msra.mxu0 %v638_v58  ;;  %v1036_v58 = vld [vmem:[#allocation10 + $0x18] sm:$0xff] }
 0x18c   : > { %1318 = vmatprep.subr.bf16.mxu0 %v1694_v0 }
 0x1f3   : > { %v687_v37 = vpop.permute.xlu0 %686  ;;  %v798_v39 = vpop.permute.xlu1 %797 }
 0x1f4   : > { %v692_v38 = vsel %vm576_vm2, %v687_v37, 0  ;;  %v803_v41 = vsel %vm576_vm2, %v798_v39, 0 }
 0x1f5   : > { %1313 = vmatpush3.bf16.xpose.msra.mxu1 %v692_v38 }
 0x1f6   : > { %1324 = vmatprep.subr.bf16.mxu1 %v1694_v0 }
 0x1f7   : > { %v684_v40 = vpop.permute.xlu0 %683  ;;  %v796_v43 = vpop.permute.xlu1 %795 }
 0x1fb   : > { %v908_v42 = vpop.permute.xlu0 %907  ;;  %v906_v45 = vpop.permute.xlu1 %905 }
 0x1fc   : > { %1315 = vmatmul.mubr.msk.bf16.vlgmr.msra.gmra.mrb[8].mxu1 %vm576_vm2, %v684_v40  ;;  %v913_v44 = vsel %vm576_vm2, %v908_v42, 0 }
 0x1fd   : > { %1325 = vmatpush3.bf16.xpose.msra.mxu1 %v803_v41  ;;  %1326 = vmatprep.mubr.msk.bf16.mxu1 %vm1695_vm0, %v1694_v0 }
 0x1fe   : > { %1336 = vmatprep.subr.bf16.mxu1 %v1694_v0 }
 0x204   : > { %1327 = vmatmul.mubr.msk.bf16.vlgmr.msra.gmra.mrb[12].mxu1 %vm576_vm2, %v796_v43 }
 0x205   : > { %1337 = vmatpush3.bf16.xpose.msra.mxu1 %v913_v44  ;;  %1338 = vmatprep.mubr.msk.bf16.mxu1 %vm1695_vm0, %v1694_v0 }
 0x206   : > { %1348 = vmatprep.subr.bf16.mxu1 %v1694_v0 }
 0x20c   : > { %1339 = vmatmul.mubr.msk.bf16.vlgmr.msra.gmra.mrb[16].mxu1 %vm576_vm2, %v906_v45 }
 0x20d   : > { %1352 = vmatprep.mubr.msk.bf16.mxu1 %vm1695_vm0, %v1694_v0 }
 0x25d   : > { %v617_v46 = vpop.f32.mrb[4].mxu1 }
 0x25e   : > { %v1304_v47 = vpop.f32.mrb[5].mxu1  ;;  %v623_v48 = vsel %vm576_vm2, %v617_v46, -inf }
 0x25f   : > { %624 = vmax.xlane.f32.xlu0 %v623_v48  ;;  %v620_v49 = vpop.f32.mrb[6].mxu1  ;;  %v1033_v47 = vld [vmem:[#allocation10] sm:$0xff]  ;;  %v1034_v48 = vld [vmem:[#allocation10 + $0x8] sm:$0xff] }
 0x260   : > { %v1305_v50 = vpop.f32.mrb[7].mxu1  ;;  %v1037_v49 = vpack.c.bf16 %v1034_v48, %v1033_v47 }
 0x262   : > { %1349 = vmatpush3.bf16.msra.mxu1 %v1037_v49 }
 0x263   : > { %1350 = vmatprep.subr.bf16.mxu1 %v1694_v0 }
 0x2cf   : > { %v728_v59 = vpop.f32.mrb[8].mxu1 }
 0x2d0   : > { %v1316_v60 = vpop.f32.mrb[9].mxu1  ;;  %v734_v61 = vsel %vm576_vm2, %v728_v59, -inf }
 0x2d1   : > { %735 = vmax.xlane.f32.xlu1 %v734_v61  ;;  %v731_v62 = vpop.f32.mrb[10].mxu1 }
 0x2d2   : > { %v1317_v63 = vpop.f32.mrb[11].mxu1 }
 0x2d7   : > { %v839_v1 = vpop.f32.mrb[12].mxu1 }
 0x2d8   : > { %v1328_v2 = vpop.f32.mrb[13].mxu1  ;;  %v845_v3 = vsel %vm576_vm2, %v839_v1, -inf }
 0x2d9   : > { %846 = vmax.xlane.f32.xlu0 %v845_v3  ;;  %v842_v4 = vpop.f32.mrb[14].mxu1 }
 0x2da   : > { %v1329_v5 = vpop.f32.mrb[15].mxu1 }
 0x2df   : > { %v949_v6 = vpop.f32.mrb[16].mxu1 }
 0x2e0   : > { %v1340_v7 = vpop.f32.mrb[17].mxu1  ;;  %v955_v8 = vsel %vm576_vm2, %v949_v6, -inf }
 0x2e1   : > { %956 = vmax.xlane.f32.xlu0 %v955_v8  ;;  %v952_v9 = vpop.f32.mrb[18].mxu1 }
 0x2e2   : > { %v1341_v10 = vpop.f32.mrb[19].mxu1  ;;  %745 = vrot.lane.b32.xlu1 %v575_v57, %s1697_s24 }
 0x2e6   : > { %965 = vrot.lane.b32.xlu1 %v575_v57, %s1698_s20 }
 0x2ec   : > { %v625_v11 = vpop.xlane.xlu0 %624 }
 0x2ed   : > { %v626_v12 = vsub.f32 %v617_v46, %v625_v11 }
 0x2ef   : > { %v627_v13 = vmul.f32 1.442695, %v626_v12 }
 0x2f1   : > { %1453 = vpow2.f32 %v627_v13 }
 0x2f7   : > { %855 = vrot.lane.b32.xlu0 %v575_v57, %s1696_s22  ;;  %v1035_v57 = vld [vmem:[#allocation10 + $0x10] sm:$0xff]  ;;  %s1104_s22 = sshll.u32 %s405_s19, 4  ;;  %s2097_s22 = int_to_ptr.vmem [resolvable:$true] %s1104_s22 }
 0x2f8   : > { %s1611_s18 = scalar_lea.vmem %s2097_s22, 128 }
 0x2f9   : > { %p1612_p6 = scmp.ne.s32.totalorder %s2097_s22, %s1611_s18 }
 0x2fb   : > { %v1454_v14 = vpop.eup %1453  ;;  %p1613_p7 = pnand %p1612_p6, %p2172_p5 }
 0x2fc   : > { %v632_v15 = vpack.c.bf16 %v1454_v14, %v1454_v14  ;;  %v629_v31 = vsel %vm576_vm2, %v1454_v14, 0.0 }
 0x2fd   : > { %p1614_p9 = pneg %p1613_p7 }
 0x2fe   : > { %1309 = vmatmul.mubr.msk.bf16.vlgmr.msra.gmra.mrb[8].mxu0 %vm576_vm2, %v632_v15 }
 0x2ff   : > { %1320 = vmatprep.mubr.msk.bf16.mxu0 %vm1695_vm0, %v1694_v0 }
 0x35e   : > { %v736_v16 = vpop.xlane.xlu1 %735 }
 0x35f   : > { %v737_v17 = vsub.f32 %v728_v59, %v736_v16  ;;  %v1038_v59 = vpack.c.bf16 %v1036_v58, %v1035_v57 }
 0x361   : > { %v738_v18 = vmul.f32 1.442695, %v737_v17  ;;  %1351 = vmatpush3.bf16.msra.mxu1 %v1038_v59 }
 0x362   : > { %v746_v19 = vpop.permute.xlu1 %745 }
 0x363   : > { %1455 = vpow2.f32 %v738_v18  ;;  %v751_v20 = vsel %vm636_vm3, %v746_v19, 0  ;;  %v1242_v18 = vld [vmem:[%s2148_s8] ss:$0 sm:$0xff] }
 0x364   : > { %1319 = vmatpush3.bf16.msra.mxu0 %v751_v20 }
 0x365   : > { %1330 = vmatprep.subr.bf16.mxu0 %v1694_v0 }
 0x366   : > { %v847_v21 = vpop.xlane.xlu0 %846  ;;  %v966_v34 = vpop.permute.xlu1 %965 }
 0x367   : > { %v848_v22 = vsub.f32 %v839_v1, %v847_v21  ;;  %v971_v37 = vsel %vm636_vm3, %v966_v34, 0 }
 0x369   : > { %v849_v23 = vmul.f32 1.442695, %v848_v22 }
 0x36b   : > { %1457 = vpow2.f32 %v849_v23 }
 0x36d   : > { %v1456_v24 = vpop.eup %1455 }
 0x36e   : > { %v957_v25 = vpop.xlane.xlu0 %956  ;;  %v740_v26 = vsel %vm576_vm2, %v1456_v24, 0.0  ;;  %v743_v27 = vpack.c.bf16 %v1456_v24, %v1456_v24 }
 0x36f   : > { %v958_v28 = vsub.f32 %v949_v6, %v957_v25  ;;  %741 = vadd.xlane.f32.xlu1 %v740_v26 }
 0x370   : > { %1321 = vmatmul.mubr.msk.bf16.vlgmr.msra.gmra.mrb[12].mxu0 %vm576_vm2, %v743_v27 }
 0x371   : > { %v959_v29 = vmul.f32 1.442695, %v958_v28  ;;  %1332 = vmatprep.mubr.msk.bf16.mxu0 %vm1695_vm0, %v1694_v0 }
 0x372   : > { %v856_v30 = vpop.permute.xlu0 %855 }
 0x373   : > { %1459 = vpow2.f32 %v959_v29  ;;  %v861_v32 = vsel %vm636_vm3, %v856_v30, 0  ;;  %630 = vadd.xlane.f32.xlu1 %v629_v31 }
 0x374   : > { %1331 = vmatpush3.bf16.msra.mxu0 %v861_v32 }
 0x375   : > { %v1458_v33 = vpop.eup %1457  ;;  %1342 = vmatprep.subr.bf16.mxu0 %v1694_v0 }
 0x376   : > { %v851_v35 = vsel %vm576_vm2, %v1458_v33, 0.0  ;;  %v854_v36 = vpack.c.bf16 %v1458_v33, %v1458_v33 }
 0x377   : > { %852 = vadd.xlane.f32.xlu0 %v851_v35 }
 0x378   : > { %1333 = vmatmul.mubr.msk.bf16.vlgmr.msra.gmra.mrb[16].mxu0 %vm576_vm2, %v854_v36 }
 0x379   : > { %1343 = vmatpush3.bf16.msra.mxu0 %v971_v37  ;;  %1344 = vmatprep.mubr.msk.bf16.mxu0 %vm1695_vm0, %v1694_v0 }
 0x37d   : > { %v1460_v38 = vpop.eup %1459 }
 0x37e   : > { %v961_v39 = vsel %vm576_vm2, %v1460_v38, 0.0  ;;  %v964_v40 = vpack.c.bf16 %v1460_v38, %v1460_v38 }
 0x37f   : > { %962 = vadd.xlane.f32.xlu0 %v961_v39 }
 0x380   : > { %1345 = vmatmul.mubr.msk.bf16.vlgmr.msra.gmra.mrb[20].mxu0 %vm576_vm2, %v964_v40 }
 0x3d1   : > { %v674_v41 = vpop.f32.mrb[8].mxu0 }
 0x3d2   : > { %v1310_v42 = vpop.f32.mrb[9].mxu0 }
 0x3d3   : > { %v677_v43 = vpop.f32.mrb[10].mxu0 }
 0x3d4   : > { %v1311_v44 = vpop.f32.mrb[11].mxu0 }
 0x3fc   : > { %v742_v45 = vpop.xlane.xlu1 %741 }
 0x3fd   : > { %1461 = vrcp.f32 %v742_v45 }
 0x400   : > { %v631_v8 = vpop.xlane.xlu1 %630 }
 0x404   : > { %v853_v46 = vpop.xlane.xlu0 %852 }
 0x405   : > { %1463 = vrcp.f32 %v853_v46 }
 0x407   : > { %v1462_v50 = vpop.eup %1461 }
 0x40c   : > { %v963_v55 = vpop.xlane.xlu0 %962 }
 0x40d   : > { %1465 = vrcp.f32 %v963_v55 }
 0x40e   : > { %1467 = vrcp.f32 %v631_v8 }
 0x40f   : > { %v1464_v60 = vpop.eup %1463 }
 0x417   : > { %v1466_v3 = vpop.eup %1465 }
 0x418   : > { %v1468_v9 = vpop.eup %1467 }
 0x419   : > { %v681_v12 = vmul.f32 %v1468_v9, %v674_v41 }
 0x443   : > { %v787_v51 = vpop.f32.mrb[12].mxu0 }
 0x444   : > { %v794_v52 = vmul.f32 %v1462_v50, %v787_v51  ;;  %v1322_v53 = vpop.f32.mrb[13].mxu0 }
 0x445   : > { %v790_v54 = vpop.f32.mrb[14].mxu0 }
 0x446   : > { %1016 = vrot.lane.b32.xlu0 %v794_v52, %s1699_s13  ;;  %v1323_v56 = vpop.f32.mrb[15].mxu0  ;;  %s1702_s13 = smov [#allocation11]  }
 0x44b   : > { %v897_v61 = vpop.f32.mrb[16].mxu0 }
 0x44c   : > { %v904_v62 = vmul.f32 %v1464_v60, %v897_v61  ;;  %v1334_v63 = vpop.f32.mrb[17].mxu0 }
 0x44d   : > { %v900_v1 = vpop.f32.mrb[18].mxu0 }
 0x44e   : > { %1020 = vrot.lane.b32.xlu1 %v904_v62, %s1700_s26  ;;  %v1335_v2 = vpop.f32.mrb[19].mxu0  ;;  %s1615_s26 = sshll.u32 %s1702_s13, 4  ;;  %s1616_s26 = int_to_ptr.vmem [resolvable:$false] %s1615_s26 }
 0x44f   : > { %p1618_p12 = scmp.lt.s32.totalorder %s2097_s22, %s1616_s26 }
 0x453   : > { %v1007_v4 = vpop.f32.mrb[20].mxu0 }
 0x454   : > { %v1014_v0 = vmul.f32 %v1466_v3, %v1007_v4  ;;  %v1346_v5 = vpop.f32.mrb[21].mxu0 }
 0x455   : > { %v1010_v6 = vpop.f32.mrb[22].mxu0 }
 0x456   : > { %1024 = vrot.lane.b32.xlu1 %v1014_v0, %s1701_s21  ;;  %v1347_v7 = vpop.f32.mrb[23].mxu0  ;;  %s1617_s21 = scalar_lea.vmem %s1616_s26, 256 }
 0x457   : > { %p1619_p3 = scmp.lt.s32.totalorder %s1617_s21, %s1611_s18 }
 0x459   : > { %p1620_p13 = por %p1619_p3, %p1618_p12 }
 0x45b   : > { %p1621_p0 = pnand %p1620_p13, %p1614_p9 }
 0x4b8   : > { %v1017_v10 = vpop.permute.xlu0 %1016 }
 0x4b9   : > { %v1027_v13 = vsel %vm576_vm2, %v681_v12, %v1017_v10 }
 0x4c0   : > { %v1021_v11 = vpop.permute.xlu1 %1020 }
 0x4c1   : > { %v1029_v14 = vsel %vm1028_vm4, %v1027_v13, %v1021_v11 }
 0x4c8   : > { %v1025_v15 = vpop.permute.xlu1 %1024 }
 0x4c9   : > { %v1031_v16 = vsel %vm1030_vm5, %v1029_v14, %v1025_v15 }
 0x4ca   : > { %v1032_v17 = vpack.c.bf16 %v1031_v16, %v1031_v16 }
 0x4cc   : > { %1353 = vmatmul.mubr.msk.bf16.vlgmr.msra.gmra.mrb[20].mxu1 %vm422_vm1, %v1032_v17 }
 0x59f   : > { %v1083_v19 = vpop.f32.mrb[20].mxu1 }
 0x5a0   : > { %v1084_v20 = vadd.f32 %v1242_v18, %v1083_v19  ;;  %v1354_v21 = vpop.f32.mrb[21].mxu1 }
 0x5a1   : > { %v1086_v22 = vpop.f32.mrb[22].mxu1 }
 0x5a2   : > { %v1355_v23 = vpop.f32.mrb[23].mxu1  ;;  %1089 = vst.msk [vmem:[%s405_s19] sm:$0xff] %vm422_vm1, %v1084_v20 }
 0x5a3   : > { %1624 = shalt.err (!%p1621_p0)
}
 0x5a4   : > { %s1625_s1 = scalar_lea.hbm %s2095_s29, 128  ;;  %s1629_s14 = scalar_lea.hbm %s2171_s9, 256 }
 0x5a5   : > { %p1626_p2 = scmp.ne.s32.totalorder %s2095_s29, %s1625_s1  ;;  %p1630_p10 = scmp.lt.u32.totalorder %s2095_s29, %s2171_s9 }
 0x5a6   : > { %p1631_p11 = scmp.lt.u32.totalorder %s1629_s14, %s1625_s1  ;;  %p1633_p6 = scmp.lt.u32.totalorder %s1625_s1, %s2095_s29 }
 0x5a7   : > { %p1627_p8 = pnand %p1626_p2, %p2172_p5 }
 0x5a8   : > { %p1632_p1 = por %p1631_p11, %p1630_p10 }
 0x5a9   : > { %p1628_p4 = pneg %p1627_p8 }
 0x5aa   : > { %p1634_p7 = por %p1633_p6, %p1632_p1 }
 0x5ac   : > { %p1635_p9 = pnand %p1634_p7, %p1628_p4 }
 0x5ae   : > { %1638 = shalt.err (!%p1635_p9)
}
 0x5af   : > { %1374 = dma.vmem_to_hbm [thread:$0]  (%p2172_p5), %s2097_s22, 128, %s2095_s29, %s1091_s15  }
 0x5b0 PF: > { %s1116_s20 = sand.u32 1, %s1673_s30   ;;  %p2173_p12 = scmp.ne.s32.totalorder %s2164_s28, 0 }
 0x5b1   : > { %p2174_p3 = scmp.ge.s32.totalorder %s1685_s12, 2  ;;  %s1117_s18 = scalar_lea.sflag [#allocation4], %s1116_s20 }
 0x5b3   : > { %p1394_p13 = pnand %p2174_p3, %p2173_p12 }
 0x5b5   : > { %1668 = dma.done.wait (!%p1394_p13), %s1117_s18, 128  }
 0x5b6   : > { %1670 = vsyncadd (!%p1394_p13), %s1117_s18, 4294967168  ;;  %p24_p0 = scmp.ge.s32.totalorder %s1905_s27, 4   ;;  %s2175_s30 = smov %s1677_s10 }
 0x5b7   : > { %s2176_s10 = smov %s1681_s11  ;;  %s2177_s11 = smov %s1916_s25 }
 0x5b8   : > { %s2178_s12 = smov %s1905_s27  ;;  %26 = sbr.rel (!%p24_p0) target bundleno = 10 (0xa), region = 117 }
 0x5bf   :  { %1122 = vsyncpa [#allocation3], 1 }
 0x5c0   :  { %1124 = vsyncpa [#allocation3 + $0x1], 1 }
 0x5c1   :  { %1125 = vsyncpa [#allocation6], 1 }
 0x5c2   :  { %1126 = vsyncpa [#allocation9], 1 }
 0x5c3   :  { %1127 = vsyncpa [#allocation4], 1 }
 0x5c4   :  { %1129 = vsyncpa [#allocation4 + $0x1], 1 }

</bundles_post_ra>
